<compile_context>
chip_gen: v7x
topology: tpu7x:2x2x1
jax: 0.10.0
libtpu: 0.0.40
codegen_flags: <defaults>
</compile_context>

<pallas_src>
import jax
import jax.numpy as jnp
from jax.experimental import pallas as pl
from jax.experimental.pallas import tpu as pltpu

BN_EPS = 1e-5


def _round_up(x: int, m: int) -> int:
    return ((x + m - 1) // m) * m


# ----------------------------------------------------------------------------
# Kernel: [dot + bias + ReLU] * (L-1) + dot + bias   (BN already folded)
# ----------------------------------------------------------------------------
def _make_mlp_kernel(num_layers: int, out_pads: tuple):
    def kernel(x_ref, *rest):
        w_refs = rest[:num_layers]          # bf16 (k_l, out_pads[l]) each
        b_ref = rest[num_layers]            # f32  (num_layers, max_pad)
        o_ref = rest[num_layers + 1]        # bf16 (tb, out_pads[-1])

        # bf16 cast in VMEM (zero HBM cost); x arrives unpadded f32.
        h = x_ref[...].astype(jnp.bfloat16)
        for l in range(num_layers):
            dpad = out_pads[l]
            acc = jnp.dot(h, w_refs[l][...],
                          preferred_element_type=jnp.float32)      # MXU, f32 acc
            bias = b_ref[pl.ds(l, 1), :][:, :dpad]                  # (1, dpad) f32
            acc = acc + bias                                        # f32 VPU
            if l < num_layers - 1:
                h = jnp.maximum(acc, 0.0).astype(jnp.bfloat16)      # ReLU f32, bf16 at MXU edge
            else:
                o_ref[...] = acc.astype(o_ref.dtype)                # lane-dense bf16 store

    return kernel


# ----------------------------------------------------------------------------
# One-time parameter preparation (fold BN, pad outputs to 128, cast, pack)
# ----------------------------------------------------------------------------
def prepare_params(params):
    """Fold eval-mode BatchNorm into the adjacent Linear layers, transpose
    weights to (in, out), zero-pad every OUTPUT feature dim to a multiple of
    128 lanes (input dim of layer 0 stays = d_in), cast MXU operands to bf16
    and pack all biases into a single f32 array."""
    num_hidden = len(params) - 1
    input_dim = params[0]["w"].shape[1]
    num_classes = params[-1]["w"].shape[0]

    # 1) Fold BN(scale, shift) of hidden layer i into Linear i+1 (exact: ReLU
    #    precedes BN and the fold is applied to the *next* layer).
    folded = []
    scale, shift = None, None
    for layer in params[:num_hidden]:
        wt = jnp.asarray(layer["w"], jnp.float32).T          # (in, out)
        b = jnp.asarray(layer["b"], jnp.float32)
        if scale is not None:
            b = b + shift @ wt
            wt = scale[:, None] * wt
        folded.append((wt, b))
        inv_std = jax.lax.rsqrt(jnp.asarray(layer["running_var"], jnp.float32) + BN_EPS)
        scale = jnp.asarray(layer["gamma"], jnp.float32) * inv_std
        shift = (jnp.asarray(layer["beta"], jnp.float32)
                 - jnp.asarray(layer["running_mean"], jnp.float32) * scale)
    wt = jnp.asarray(params[-1]["w"], jnp.float32).T
    b = jnp.asarray(params[-1]["b"], jnp.float32)
    if scale is not None:
        b = b + shift @ wt
        wt = scale[:, None] * wt
    folded.append((wt, b))

    # 2) Pad OUTPUT dims to 128 lanes (padded rows/cols are zero -> exact).
    #    Layer 0 keeps K = input_dim (x is passed unpadded).
    weights, biases, out_pads = [], [], []
    prev_pad = input_dim
    for wt, bb in folded:
        d_in, d_out = wt.shape
        d_out_pad = _round_up(d_out, 128)
        w_p = jnp.zeros((prev_pad, d_out_pad), jnp.float32).at[:d_in, :d_out].set(wt)
        b_p = jnp.zeros((d_out_pad,), jnp.float32).at[:d_out].set(bb)
        weights.append(w_p.astype(jnp.bfloat16))     # bf16 MXU operand
        biases.append(b_p)                           # f32 (VPU math stays f32)
        out_pads.append(d_out_pad)
        prev_pad = d_out_pad

    max_pad = max(out_pads)
    biases_packed = jnp.zeros((len(biases), max_pad), jnp.float32)
    for l, b_p in enumerate(biases):
        biases_packed = biases_packed.at[l, : b_p.shape[0]].set(b_p)

    return dict(weights=weights, biases=biases_packed, out_pads=tuple(out_pads),
                input_dim=input_dim, num_classes=num_classes)


# ----------------------------------------------------------------------------
# Forward wrapper
# ----------------------------------------------------------------------------
def movement_classifier_forward(x, prepared, *, block_b=512):
    weights = prepared["weights"]
    biases = prepared["biases"]
    out_pads = prepared["out_pads"]
    num_classes = prepared["num_classes"]
    d_in = prepared["input_dim"]
    num_layers = len(weights)

    x = jnp.asarray(x, jnp.float32)
    B = x.shape[0]
    assert x.shape[1] == d_in

    # Divisor-aware batch tile: minimize padded rows, and force >= 2 grid
    # steps for B >= 16 so "parallel" semantics uses both v7x TensorCores.
    min_tiles = 2 if B >= 16 else 1
    n_tiles = max(pl.cdiv(B, block_b), min_tiles)
    tb = _round_up(pl.cdiv(B, n_tiles), 8)
    b_pad = _round_up(B, tb)
    if b_pad != B:
        x = jnp.pad(x, ((0, b_pad - B), (0, 0)))     # rows only; features unpadded

    kernel = _make_mlp_kernel(num_layers, out_pads)

    # x block (tb, d_in): last dim equals full array dim -> legal without 128 pad.
    in_specs = [pl.BlockSpec((tb, d_in), lambda i: (i, 0))]
    in_specs += [pl.BlockSpec(w.shape, lambda i: (0, 0)) for w in weights]   # VMEM-resident
    in_specs += [pl.BlockSpec(biases.shape, lambda i: (0, 0))]               # one packed bias DMA
    out_spec = pl.BlockSpec((tb, out_pads[-1]), lambda i: (i, 0))            # lane-dense bf16

    out = pl.pallas_call(
        kernel,
        grid=(b_pad // tb,),
        in_specs=in_specs,
        out_specs=out_spec,
        out_shape=jax.ShapeDtypeStruct((b_pad, out_pads[-1]), jnp.bfloat16),
        compiler_params=pltpu.CompilerParams(
            dimension_semantics=("parallel",),       # shard batch tiles across TCs
        ),
    )(x, *weights, biases)

    # Tiny slice + cast; keep f32 logits at the module boundary.
    return out[:B, :num_classes].astype(jnp.float32)


# ----------------------------------------------------------------------------
# Parameter init + references
# ----------------------------------------------------------------------------
def init_params(key, input_dim, hidden_dims, num_classes):
    """Deterministic parameter init (PyTorch-Linear-style uniform bounds)."""
    params = []
    prev = input_dim
    for dim in hidden_dims:
        key, kw, kb, kg, kbt, krm, krv = jax.random.split(key, 7)
        bound = 1.0 / jnp.sqrt(prev)
        params.append(dict(
            w=jax.random.uniform(kw, (dim, prev), jnp.float32, -bound, bound),
            b=jax.random.uniform(kb, (dim,), jnp.float32, -bound, bound),
            gamma=1.0 + 0.1 * jax.random.normal(kg, (dim,), jnp.float32),
            beta=0.1 * jax.random.normal(kbt, (dim,), jnp.float32),
            running_mean=0.05 * jax.random.normal(krm, (dim,), jnp.float32),
            running_var=1.0 + 0.1 * jax.random.uniform(krv, (dim,), jnp.float32),
        ))
        prev = dim
    key, kw, kb = jax.random.split(key, 3)
    bound = 1.0 / jnp.sqrt(prev)
    params.append(dict(
        w=jax.random.uniform(kw, (num_classes, prev), jnp.float32, -bound, bound),
        b=jax.random.uniform(kb, (num_classes,), jnp.float32, -bound, bound),
    ))
    return params


def reference_forward(x, params):
    """Pure-JAX f32 reference of the original eval-mode forward."""
    h = jnp.asarray(x, jnp.float32)
    for layer in params[:-1]:
        h = h @ layer["w"].T + layer["b"]
        h = jnp.maximum(h, 0.0)
        h = (h - layer["running_mean"]) / jnp.sqrt(layer["running_var"] + BN_EPS)
        h = h * layer["gamma"] + layer["beta"]
    return h @ params[-1]["w"].T + params[-1]["b"]


def prepared_reference(x, prepared):
    """Pure-JAX model of exactly what the kernel computes (BN folded +
    bf16 MXU-edge quantization, f32 accumulation, bf16 output store)."""
    h = jnp.asarray(x, jnp.float32).astype(jnp.bfloat16).astype(jnp.float32)
    num_layers = len(prepared["weights"])
    out = None
    for l in range(num_layers):
        w = prepared["weights"][l].astype(jnp.float32)
        dpad = prepared["out_pads"][l]
        acc = (jnp.dot(h, w, precision=jax.lax.Precision.HIGHEST)
               + prepared["biases"][l, :dpad])
        if l < num_layers - 1:
            h = jnp.maximum(acc, 0.0).astype(jnp.bfloat16).astype(jnp.float32)
        else:
            out = acc.astype(jnp.bfloat16).astype(jnp.float32)
    return out[:, :prepared["num_classes"]]


if __name__ == "__main__":
    key = jax.random.PRNGKey(0)

    batch = 8
    input_dim = 32
    hidden_dims = [64, 32]
    num_classes = 8

    key, kx, kp = jax.random.split(key, 3)
    x = jax.random.normal(kx, (batch, input_dim), jnp.float32)
    params = init_params(kp, input_dim, hidden_dims, num_classes)

    prepared = prepare_params(params)   # one-time prep (hoisted out of forward)

    logits = movement_classifier_forward(x, prepared)
    logits = jax.block_until_ready(logits)
    assert logits.shape == (batch, num_classes)

    # Tight check: kernel vs a pure-JAX model of exactly what it computes.
    ref_q = prepared_reference(x, prepared)
    err_q = float(jnp.max(jnp.abs(logits - ref_q)))
    assert jnp.allclose(logits, ref_q, atol=5e-2, rtol=2e-2), err_q

    # Semantics check vs the original full-f32 eval-mode forward; the only
    # difference is bf16 quantization at the MXU edge and of the stored logits.
    ref = reference_forward(x, params)
    err = float(jnp.max(jnp.abs(logits - ref)))
    assert jnp.allclose(logits, ref, atol=1.5e-1, rtol=5e-2), err

    print("KERNEL_OK")
</pallas_src>

<mosaic_0001>
module attributes {stable_mosaic.version = 11 : i64} {
  func.func @kernel(%arg0: i32, %arg1: memref<8x32xf32, #tpu.memory_space<vmem>>, %arg2: memref<32x128xbf16, #tpu.memory_space<vmem>>, %arg3: memref<128x128xbf16, #tpu.memory_space<vmem>>, %arg4: memref<128x128xbf16, #tpu.memory_space<vmem>>, %arg5: memref<3x128xf32, #tpu.memory_space<vmem>>, %arg6: memref<8x128xbf16, #tpu.memory_space<vmem>>) attributes {dimension_semantics = [#tpu.dimension_semantics<parallel>], iteration_bounds = array<i64: 1>, scalar_prefetch = 0 : i64, scratch_operands = 0 : i64, tpu.core_type = #tpu.core_type<tc>, window_params = [{transform_indices = @transform_0, window_bounds = array<i64: 8, 32>}, {pipeline_mode = #tpu.pipeline_mode<synchronous>, transform_indices = @transform_1, window_bounds = array<i64: 32, 128>}, {pipeline_mode = #tpu.pipeline_mode<synchronous>, transform_indices = @transform_2, window_bounds = array<i64: 128, 128>}, {pipeline_mode = #tpu.pipeline_mode<synchronous>, transform_indices = @transform_3, window_bounds = array<i64: 128, 128>}, {pipeline_mode = #tpu.pipeline_mode<synchronous>, transform_indices = @transform_4, window_bounds = array<i64: 3, 128>}, {transform_indices = @transform_5, window_bounds = array<i64: 8, 128>}]} {
    %c0 = arith.constant 0 : index
    %c0_0 = arith.constant 0 : index
    %0 = vector.load %arg1[%c0, %c0_0] : memref<8x32xf32, #tpu.memory_space<vmem>>, vector<8x32xf32>
    %1 = arith.truncf %0 : vector<8x32xf32> to vector<8x32xbf16>
    %c0_1 = arith.constant 0 : index
    %c0_2 = arith.constant 0 : index
    %2 = vector.load %arg2[%c0_1, %c0_2] : memref<32x128xbf16, #tpu.memory_space<vmem>>, vector<32x128xbf16>
    %cst = arith.constant dense<0.000000e+00> : vector<8x128xf32>
    %3 = tpu.matmul %1, %2, %cst {dimension_numbers = #tpu.dot_dimension_numbers<[1], [0], [0], [1], [0, 0, 1, 1], [], []>} : vector<8x32xbf16>, vector<32x128xbf16>, vector<8x128xf32> -> vector<8x128xf32>
    %c0_3 = arith.constant 0 : index
    %c0_4 = arith.constant 0 : index
    %4 = vector.load %arg5[%c0_3, %c0_4] : memref<3x128xf32, #tpu.memory_space<vmem>>, vector<1x128xf32>
    %5 = vector.broadcast %4 : vector<1x128xf32> to vector<8x128xf32>
    %6 = arith.addf %3, %5 : vector<8x128xf32>
    %cst_5 = arith.constant 0.000000e+00 : f32
    %7 = vector.broadcast %cst_5 : f32 to vector<8x128xf32>
    %8 = arith.maximumf %6, %7 : vector<8x128xf32>
    %9 = arith.truncf %8 : vector<8x128xf32> to vector<8x128xbf16>
    %c0_6 = arith.constant 0 : index
    %c0_7 = arith.constant 0 : index
    %10 = vector.load %arg3[%c0_6, %c0_7] : memref<128x128xbf16, #tpu.memory_space<vmem>>, vector<128x128xbf16>
    %cst_8 = arith.constant dense<0.000000e+00> : vector<8x128xf32>
    %11 = tpu.matmul %9, %10, %cst_8 {dimension_numbers = #tpu.dot_dimension_numbers<[1], [0], [0], [1], [0, 0, 1, 1], [], []>} : vector<8x128xbf16>, vector<128x128xbf16>, vector<8x128xf32> -> vector<8x128xf32>
    %c1 = arith.constant 1 : index
    %c0_9 = arith.constant 0 : index
    %12 = vector.load %arg5[%c1, %c0_9] : memref<3x128xf32, #tpu.memory_space<vmem>>, vector<1x128xf32>
    %13 = vector.broadcast %12 : vector<1x128xf32> to vector<8x128xf32>
    %14 = arith.addf %11, %13 : vector<8x128xf32>
    %cst_10 = arith.constant 0.000000e+00 : f32
    %15 = vector.broadcast %cst_10 : f32 to vector<8x128xf32>
    %16 = arith.maximumf %14, %15 : vector<8x128xf32>
    %17 = arith.truncf %16 : vector<8x128xf32> to vector<8x128xbf16>
    %c0_11 = arith.constant 0 : index
    %c0_12 = arith.constant 0 : index
    %18 = vector.load %arg4[%c0_11, %c0_12] : memref<128x128xbf16, #tpu.memory_space<vmem>>, vector<128x128xbf16>
    %cst_13 = arith.constant dense<0.000000e+00> : vector<8x128xf32>
    %19 = tpu.matmul %17, %18, %cst_13 {dimension_numbers = #tpu.dot_dimension_numbers<[1], [0], [0], [1], [0, 0, 1, 1], [], []>} : vector<8x128xbf16>, vector<128x128xbf16>, vector<8x128xf32> -> vector<8x128xf32>
    %c2 = arith.constant 2 : index
    %c0_14 = arith.constant 0 : index
    %20 = vector.load %arg5[%c2, %c0_14] : memref<3x128xf32, #tpu.memory_space<vmem>>, vector<1x128xf32>
    %21 = vector.broadcast %20 : vector<1x128xf32> to vector<8x128xf32>
    %22 = arith.addf %19, %21 : vector<8x128xf32>
    %23 = arith.truncf %22 : vector<8x128xf32> to vector<8x128xbf16>
    %c0_15 = arith.constant 0 : index
    %c0_16 = arith.constant 0 : index
    %24 = vector.load %arg6[%c0_15, %c0_16] : memref<8x128xbf16, #tpu.memory_space<vmem>>, vector<8x128xbf16>
    tpu.vector_store %arg6[%c0_15, %c0_16], %23 {strides = array<i32>} : memref<8x128xbf16, #tpu.memory_space<vmem>>, vector<8x128xbf16>,
    return
  }
  func.func @transform_0(%arg0: i32) -> (i32, i32) {
    %c0_i32 = arith.constant 0 : i32
    %c0_i32_0 = arith.constant 0 : i32
    return %arg0, %c0_i32 : i32, i32
  }
  func.func @transform_1(%arg0: i32) -> (i32, i32) {
    %c0_i32 = arith.constant 0 : i32
    %c0_i32_0 = arith.constant 0 : i32
    %c0_i32_1 = arith.constant 0 : i32
    return %c0_i32, %c0_i32_0 : i32, i32
  }
  func.func @transform_2(%arg0: i32) -> (i32, i32) {
    %c0_i32 = arith.constant 0 : i32
    %c0_i32_0 = arith.constant 0 : i32
    %c0_i32_1 = arith.constant 0 : i32
    return %c0_i32, %c0_i32_0 : i32, i32
  }
  func.func @transform_3(%arg0: i32) -> (i32, i32) {
    %c0_i32 = arith.constant 0 : i32
    %c0_i32_0 = arith.constant 0 : i32
    %c0_i32_1 = arith.constant 0 : i32
    return %c0_i32, %c0_i32_0 : i32, i32
  }
  func.func @transform_4(%arg0: i32) -> (i32, i32) {
    %c0_i32 = arith.constant 0 : i32
    %c0_i32_0 = arith.constant 0 : i32
    %c0_i32_1 = arith.constant 0 : i32
    return %c0_i32, %c0_i32_0 : i32, i32
  }
  func.func @transform_5(%arg0: i32) -> (i32, i32) {
    %c0_i32 = arith.constant 0 : i32
    %c0_i32_0 = arith.constant 0 : i32
    return %arg0, %c0_i32 : i32, i32
  }
}

</mosaic_0001>

<bundles_post_ra>
// kernel: tpu_custom_call.1
= control target key start
LH: loop header
LB: loop body
LE: loop exit
PB: predicated region body
PF: predicated region fallthrough
CT: control target
= control target key end

     0   :  { %10 = vsyncpa [#allocation3], 0  ;;  %s760_s0 = inlined_call_operand.hbm [shape: f32[8,32], index: 0, kind: input, shape index: {}]   ;;  %s761_s1 = inlined_call_operand.hbm [shape: bf16[32,128], index: 1, kind: input, shape index: {}]   ;;  %s762_s2 = inlined_call_operand.hbm [shape: bf16[128,128], index: 2, kind: input, shape index: {}]   ;;  %s763_s3 = inlined_call_operand.hbm [shape: bf16[128,128], index: 3, kind: input, shape index: {}]   ;;  %s764_s4 = inlined_call_operand.vmem [shape: f32[3,128], index: 4, kind: input, shape index: {}]   ;;  %s765_s5 = inlined_call_operand.hbm [shape: bf16[8,128], index: 5, kind: output, shape index: {}]  }
   0x1   :  { %11 = vsyncpa [#allocation6], 0 }
   0x2   :  { %12 = vsyncpa [#allocation9], 0 }
   0x3   :  { %13 = vsyncpa [#allocation4], 0  ;;  %s619_s18 = smov [#allocation5]   ;;  %s501_s22 = scalar_lea.hbm %s761_s1, 256 }
   0x4   :  { %s29_s19 = sshll.u32 %s619_s18, 4  ;;  %p502_p0 = scmp.ne.s32.totalorder %s761_s1, %s501_s22  ;;  %s30_s19 = int_to_ptr.vmem [resolvable:$true] %s29_s19 }
   0x5   :  { %p505_p1 = scmp.lt.u32.totalorder %s501_s22, %s761_s1 }
   0x7   :  { %p507_p2 = pnand %p505_p1, %p502_p0 }
   0x9   :  { %510 = shalt.err (!%p507_p2)
}
   0xa   :  { %s511_s27 = scalar_lea.vmem %s30_s19, 256  ;;  %p516_p4 = scmp.lt.s32.totalorder %s30_s19, %s30_s19 }
   0xb   :  { %p512_p3 = scmp.ne.s32.totalorder %s30_s19, %s511_s27  ;;  %p517_p5 = scmp.lt.s32.totalorder %s511_s27, %s511_s27 }
   0xd   :  { %p518_p6 = por %p517_p5, %p516_p4 }
   0xf   :  { %p519_p7 = pnand %p518_p6, %p512_p3 }
  0x11   :  { %522 = shalt.err (!%p519_p7)
}
  0x12   :  { %s620_s28 = smov 64   ;;  %s621_s29 = smov 4  }
  0x13   :  { %35 = dma.hbm_to_vmem [thread:$0]  %s761_s1, 256, %s30_s19, [#allocation6], %s620_s28, %s620_s28, %s621_s29  }
  0x14   :  { %s622_s7 = smov [#allocation2]   ;;  %s623_s9 = smov [#allocation7]  }
  0x15   :  { %s20_s8 = sshll.u32 %s622_s7, 4  ;;  %s41_s10 = sshll.u32 %s623_s9, 4  ;;  %s21_s8 = int_to_ptr.vmem [resolvable:$true] %s20_s8  ;;  %s42_s10 = int_to_ptr.vmem [resolvable:$true] %s41_s10 }
  0x16   :  { %s523_s13 = scalar_lea.hbm %s760_s0, 128 }
  0x17   :  { %p524_p8 = scmp.ne.s32.totalorder %s760_s0, %s523_s13  ;;  %p527_p9 = scmp.lt.u32.totalorder %s523_s13, %s760_s0 }
  0x19   :  { %p529_p10 = pnand %p527_p9, %p524_p8 }
  0x1b   :  { %532 = shalt.err (!%p529_p10)
}
  0x1c   :  { %s533_s1 = scalar_lea.vmem %s21_s8, 128  ;;  %p538_p12 = scmp.lt.s32.totalorder %s21_s8, %s21_s8 }
  0x1d   :  { %p534_p11 = scmp.ne.s32.totalorder %s21_s8, %s533_s1  ;;  %p539_p13 = scmp.lt.s32.totalorder %s533_s1, %s533_s1 }
  0x1f   :  { %p540_p0 = por %p539_p13, %p538_p12 }
  0x21   :  { %p541_p1 = pnand %p540_p0, %p534_p11 }
  0x23   :  { %544 = shalt.err (!%p541_p1)
}
  0x24   :  { %23 = dma.hbm_to_vmem [thread:$0]  %s760_s0, 128, %s21_s8, [#allocation3]  }
  0x25   :  { %s545_s22 = scalar_lea.hbm %s762_s2, 1024 }
  0x26   :  { %p546_p2 = scmp.ne.s32.totalorder %s762_s2, %s545_s22  ;;  %p549_p3 = scmp.lt.u32.totalorder %s545_s22, %s762_s2 }
  0x28   :  { %p551_p4 = pnand %p549_p3, %p546_p2 }
  0x2a   :  { %554 = shalt.err (!%p551_p4)
}
  0x2b   :  { %s555_s27 = scalar_lea.vmem %s42_s10, 1024  ;;  %p560_p6 = scmp.lt.s32.totalorder %s42_s10, %s42_s10 }
  0x2c   :  { %p556_p5 = scmp.ne.s32.totalorder %s42_s10, %s555_s27  ;;  %p561_p7 = scmp.lt.s32.totalorder %s555_s27, %s555_s27 }
  0x2e   :  { %p562_p8 = por %p561_p7, %p560_p6 }
  0x30   :  { %p563_p9 = pnand %p562_p8, %p556_p5 }
  0x32   :  { %566 = shalt.err (!%p563_p9)
}
  0x33   :  { %47 = dma.hbm_to_vmem [thread:$0]  %s762_s2, 1024, %s42_s10, [#allocation6], %s620_s28, %s620_s28, %s621_s29  }
  0x34   :  { %s624_s6 = smov [#allocation8]   ;;  %s567_s11 = scalar_lea.hbm %s763_s3, 1024 }
  0x35   :  { %s53_s7 = sshll.u32 %s624_s6, 4  ;;  %p568_p10 = scmp.ne.s32.totalorder %s763_s3, %s567_s11  ;;  %s54_s7 = int_to_ptr.vmem [resolvable:$true] %s53_s7 }
  0x36   :  { %p571_p11 = scmp.lt.u32.totalorder %s567_s11, %s763_s3 }
  0x38   :  { %p573_p12 = pnand %p571_p11, %p568_p10 }
  0x3a   :  { %576 = shalt.err (!%p573_p12)
}
  0x3b   :  { %s577_s16 = scalar_lea.vmem %s54_s7, 1024  ;;  %p582_p0 = scmp.lt.s32.totalorder %s54_s7, %s54_s7 }
  0x3c   :  { %p578_p13 = scmp.ne.s32.totalorder %s54_s7, %s577_s16  ;;  %p583_p1 = scmp.lt.s32.totalorder %s577_s16, %s577_s16 }
  0x3e   :  { %p584_p2 = por %p583_p1, %p582_p0 }
  0x40   :  { %p585_p3 = pnand %p584_p2, %p578_p13 }
  0x42   :  { %588 = shalt.err (!%p585_p3)
}
  0x43   :  { %59 = dma.hbm_to_vmem [thread:$0]  %s763_s3, 1024, %s54_s7, [#allocation9], %s620_s28, %s620_s28, %s621_s29  }
  0x44   :  { %611 = dma.done.wait [#allocation3], 128  }
  0x45   :  { %612 = vsyncadd [#allocation3], 4294967168 }
  0x46   :  { %613 = dma.done.wait [#allocation6], 1280  }
  0x47   :  { %614 = vsyncadd [#allocation6], 4294966016 }
  0x48   :  { %615 = dma.done.wait [#allocation9], 1024  }
  0x49   :  { %616 = vsyncadd [#allocation9], 4294966272  ;;  %v625_v0 = vmov 0.0   ;;  %vm626_vm0 = vmmov 0   ;;  %v483_v1 = vld [vmem:[#allocation5] sm:$0xff]   ;;  %v484_v2 = vld [vmem:[#allocation5 + $0x8] sm:$0xff]  }
  0x4a   :  { %426 = vmatprep.subr.bf16.mxu0 %v625_v0  ;;  %430 = vmatprep.mubr.msk.bf16.mxu0 %vm626_vm0, %v625_v0  ;;  %v75_v3 = vld [vmem:[#allocation2] sm:$0xff]  ;;  %v485_v4 = vld [vmem:[#allocation7] sm:$0xff]   ;;  %vm98_vm1 = vcmask 261120   ;;  %v487_v7 = vld [vmem:[#allocation7 + $0x10] sm:$0xff]   ;;  %s627_s19 = smov [#allocation10]  }
  0x4b   :  { %434 = vmatprep.subr.bf16.mxu1 %v625_v0  ;;  %450 = vmatprep.mubr.msk.bf16.mxu1 %vm626_vm0, %v625_v0  ;;  %v76_v5 = vpack.c.bf16 %v75_v3, %v75_v3  ;;  %v486_v6 = vld [vmem:[#allocation7 + $0x8] sm:$0xff]   ;;  %v488_v8 = vld [vmem:[#allocation7 + $0x18] sm:$0xff]   ;;  %v489_v9 = vld [vmem:[#allocation7 + $0x20] sm:$0xff]   ;;  %s372_s20 = sshll.u32 %s627_s19, 4  ;;  %s373_s20 = int_to_ptr.vmem [resolvable:$true] %s372_s20 }
  0x4c   :  { %427 = vmatpush3.bf16.msra.mxu0 %v483_v1  ;;  %435 = vmatpush3.bf16.msra.mxu1 %v485_v4  ;;  %v490_v10 = vld [vmem:[#allocation7 + $0x28] sm:$0xff]   ;;  %v491_v11 = vld [vmem:[#allocation7 + $0x30] sm:$0xff]   ;;  %v492_v12 = vld [vmem:[#allocation7 + $0x38] sm:$0xff]   ;;  %s589_s21 = scalar_lea.vmem %s373_s20, 64  ;;  %p594_p5 = scmp.lt.s32.totalorder %s373_s20, %s373_s20 }
  0x4d   :  { %428 = vmatprep.subr.bf16.mxu0 %v625_v0  ;;  %436 = vmatprep.subr.bf16.mxu1 %v625_v0  ;;  %v493_v13 = vld [vmem:[#allocation8] sm:$0xff]   ;;  %v494_v14 = vld [vmem:[#allocation8 + $0x8] sm:$0xff]   ;;  %v495_v15 = vld [vmem:[#allocation8 + $0x10] sm:$0xff]   ;;  %p590_p4 = scmp.ne.s32.totalorder %s373_s20, %s589_s21  ;;  %p595_p6 = scmp.lt.s32.totalorder %s589_s21, %s589_s21 }
  0x4e   :  { %v496_v16 = vld [vmem:[#allocation8 + $0x18] sm:$0xff]   ;;  %v497_v17 = vld [vmem:[#allocation8 + $0x20] sm:$0xff]   ;;  %v498_v18 = vld [vmem:[#allocation8 + $0x28] sm:$0xff]  }
  0x4f   :  { %v383_v19 = vld [vmem:[%s764_s4] ss:$0 sm:$0xff]  ;;  %v499_v27 = vld [vmem:[#allocation8 + $0x30] sm:$0xff]   ;;  %v500_v28 = vld [vmem:[#allocation8 + $0x38] sm:$0xff]   ;;  %p596_p7 = por %p595_p6, %p594_p5 }
  0x50   :  { %429 = vmatpush3.bf16.msra.mxu0 %v484_v2  ;;  %437 = vmatpush3.bf16.msra.mxu1 %v486_v6  ;;  %v387_v29 = vld [vmem:[%s764_s4 + $0x1] ss:$0 sm:$0xff]  ;;  %v396_v37 = vld [vmem:[%s764_s4 + $0x2] ss:$0 sm:$0xff] }
  0x51   :  { %454 = vmatprep.subr.bf16.mxu0 %v625_v0  ;;  %438 = vmatprep.subr.bf16.mxu1 %v625_v0  ;;  %p597_p8 = pnand %p596_p7, %p590_p4 }
  0x53   :  { %431 = vmatmul.mubr.msk.bf16.vlgmr.msra.gmra.mrb[0].mxu0 %vm98_vm1, %v76_v5 }
  0x54   :  { %470 = vmatprep.mubr.msk.bf16.mxu0 %vm626_vm0, %v625_v0  ;;  %439 = vmatpush3.bf16.msra.mxu1 %v487_v7 }
  0x55   :  { %440 = vmatprep.subr.bf16.mxu1 %v625_v0  ;;  %455 = vmatpush3.bf16.msra.mxu0 %v493_v13 }
  0x56   :  { %456 = vmatprep.subr.bf16.mxu0 %v625_v0 }
  0x58   :  { %441 = vmatpush3.bf16.msra.mxu1 %v488_v8 }
  0x59   :  { %442 = vmatprep.subr.bf16.mxu1 %v625_v0  ;;  %457 = vmatpush3.bf16.msra.mxu0 %v494_v14 }
  0x5a   :  { %458 = vmatprep.subr.bf16.mxu0 %v625_v0 }
  0x5c   :  { %443 = vmatpush3.bf16.msra.mxu1 %v489_v9 }
  0x5d   :  { %444 = vmatprep.subr.bf16.mxu1 %v625_v0  ;;  %459 = vmatpush3.bf16.msra.mxu0 %v495_v15 }
  0x5e   :  { %460 = vmatprep.subr.bf16.mxu0 %v625_v0 }
  0x60   :  { %445 = vmatpush3.bf16.msra.mxu1 %v490_v10 }
  0x61   :  { %446 = vmatprep.subr.bf16.mxu1 %v625_v0  ;;  %461 = vmatpush3.bf16.msra.mxu0 %v496_v16 }
  0x62   :  { %462 = vmatprep.subr.bf16.mxu0 %v625_v0 }
  0x64   :  { %447 = vmatpush3.bf16.msra.mxu1 %v491_v11 }
  0x65   :  { %448 = vmatprep.subr.bf16.mxu1 %v625_v0  ;;  %463 = vmatpush3.bf16.msra.mxu0 %v497_v17 }
  0x66   :  { %464 = vmatprep.subr.bf16.mxu0 %v625_v0 }
  0x68   :  { %449 = vmatpush3.bf16.msra.mxu1 %v492_v12 }
  0x69   :  { %465 = vmatpush3.bf16.msra.mxu0 %v498_v18 }
  0x6a   :  { %466 = vmatprep.subr.bf16.mxu0 %v625_v0 }
  0x6d   :  { %467 = vmatpush3.bf16.msra.mxu0 %v499_v27 }
  0x6e   :  { %468 = vmatprep.subr.bf16.mxu0 %v625_v0 }
  0x71   :  { %469 = vmatpush3.bf16.msra.mxu0 %v500_v28 }
 0x126   :  { %v136_v20 = vpop.f32.mrb[0].mxu0 }
 0x127   :  { %v137_v21 = vadd.f32 %v383_v19, %v136_v20  ;;  %v432_v22 = vpop.f32.mrb[1].mxu0 }
 0x128   :  { %v139_v23 = vpop.f32.mrb[2].mxu0 }
 0x129   :  { %v142_v24 = vmax.f32 %v137_v21, 0.0  ;;  %v433_v25 = vpop.f32.mrb[3].mxu0 }
 0x12b   :  { %v143_v26 = vpack.c.bf16 %v142_v24, %v142_v24 }
 0x12d   :  { %451 = vmatmul.mubr.bf16.vlgmr.msra.gmra.mrb[0].mxu1 %v143_v26 }
 0x200   :  { %v247_v30 = vpop.f32.mrb[0].mxu1 }
 0x201   :  { %v248_v31 = vadd.f32 %v387_v29, %v247_v30  ;;  %v452_v32 = vpop.f32.mrb[1].mxu1 }
 0x202   :  { %v250_v33 = vpop.f32.mrb[2].mxu1 }
 0x203   :  { %v253_v34 = vmax.f32 %v248_v31, 0.0  ;;  %v453_v35 = vpop.f32.mrb[3].mxu1 }
 0x205   :  { %v254_v36 = vpack.c.bf16 %v253_v34, %v253_v34 }
 0x207   :  { %471 = vmatmul.mubr.bf16.vlgmr.msra.gmra.mrb[4].mxu0 %v254_v36 }
 0x2da   :  { %v358_v38 = vpop.f32.mrb[4].mxu0 }
 0x2db   :  { %v359_v39 = vadd.f32 %v396_v37, %v358_v38  ;;  %v472_v40 = vpop.f32.mrb[5].mxu0 }
 0x2dc   :  { %v361_v41 = vpop.f32.mrb[6].mxu0 }
 0x2dd   :  { %v364_v42 = vpack.c.bf16 %v359_v39, %v359_v39  ;;  %v473_v43 = vpop.f32.mrb[7].mxu0 }
 0x2df   :  { %365 = vst [vmem:[#allocation10] sm:$0xf] %v364_v42 }
 0x2e0   :  { %600 = shalt.err (!%p597_p8)
}
 0x2e1   :  { %s601_s4 = scalar_lea.hbm %s765_s5, 64 }
 0x2e2   :  { %p602_p9 = scmp.ne.s32.totalorder %s765_s5, %s601_s4  ;;  %p605_p10 = scmp.lt.u32.totalorder %s601_s4, %s765_s5 }
 0x2e4   :  { %p607_p11 = pnand %p605_p10, %p602_p9 }
 0x2e6   :  { %610 = shalt.err (!%p607_p11)
}
 0x2e7   :  { %375 = dma.vmem_to_hbm [thread:$0]  %s373_s20, 64, %s765_s5, [#allocation4]  }
 0x2e8   :  { %617 = dma.done.wait [#allocation4], 64  }
 0x2e9   :  { %618 = vsyncadd [#allocation4], 4294967232 }
 0x2ea   :  { %379 = vsyncpa [#allocation3], 1 }
 0x2eb   :  { %380 = vsyncpa [#allocation6], 1 }
 0x2ec   :  { %381 = vsyncpa [#allocation9], 1 }
 0x2ed   :  { %382 = vsyncpa [#allocation4], 1 }

</bundles_post_ra>
